<compile_context>
chip_gen: v7x
topology: tpu7x:2x2x1
jax: 0.10.0
libtpu: 0.0.40
codegen_flags: <defaults>
</compile_context>

<pallas_src>
import functools
import math

import jax
import jax.numpy as jnp
from jax.experimental import pallas as pl
from jax.experimental.pallas import tpu as pltpu

EMB = 6      # embedding_size
HID = 100    # hidden_size
CTX = 5      # context_length
VOCAB = 29   # vocab_size

VP_IN = 32           # per-context-slot padded vocab (one-hot block width)
K_IN = CTX * VP_IN   # 160: contraction dim of fused embed+flatten+Linear1
HP = 128             # lane-dense padded hidden
VP_OUT = 128         # lane-dense padded vocab (logits)
NEG = -1e30          # finite "-inf" for padded logit columns


def simplebook_kernel(it_ref, w1f_ref, b1_ref, w2_ref, b2_ref, *out_refs,
                      b_total, tb, padded, emit_logits, has_targets):
    # it_ref:  (TB, CTX+1) i32 -- [:, :CTX] token ids, [:, CTX] target
    # w1f_ref: (K_IN, HP)  f32 -- fused (embed @ W1_slot) blocks, zero-padded
    # b1_ref:  (1, HP)     f32 -- zero-padded
    # w2_ref:  (HP, VP_OUT) f32 -- zero-padded
    # b2_ref:  (1, VP_OUT) f32 -- padded columns = NEG
    # out_refs: [logits (TB, VP_OUT) f32]   if emit_logits
    #           [loss   (1, 1, 1)    f32]   if has_targets
    if emit_logits and has_targets:
        logits_ref, loss_ref = out_refs
    elif emit_logits:
        (logits_ref,) = out_refs
        loss_ref = None
    else:
        (loss_ref,) = out_refs
        logits_ref = None

    it = it_ref[...]                                         # (TB, CTX+1)

    # ---- fused embedding gather+flatten as a block one-hot (lean VPU path) ----
    # slot c occupies lanes [c*32, c*32+32); token ids < 32 so hits are disjoint.
    lane = jax.lax.broadcasted_iota(jnp.int32, (tb, K_IN), 1)
    hit = lane == it[:, 0:1]
    for c in range(1, CTX):                                  # CTX=5, unrolled
        hit = jnp.logical_or(hit, lane == it[:, c:c + 1] + c * VP_IN)
    onehot = hit.astype(jnp.float32)                         # (TB, K_IN)

    # ---- MLP on the MXU: (TB,160)@(160,128) -> tanh -> (TB,128)@(128,128) ----
    h = jnp.tanh(
        jnp.dot(onehot, w1f_ref[...], preferred_element_type=jnp.float32)
        + b1_ref[...])
    logits = (jnp.dot(h, w2_ref[...], preferred_element_type=jnp.float32)
              + b2_ref[...])

    if emit_logits:
        logits_ref[...] = logits                             # lane-dense store

    if has_targets:
        # ---- cross-entropy (padded columns hold NEG -> no effect on LSE) ----
        m = jnp.max(logits, axis=-1, keepdims=True)
        lse = m + jnp.log(jnp.sum(jnp.exp(logits - m), axis=-1, keepdims=True))
        tgt = it[:, CTX:CTX + 1]                             # (TB, 1)
        vlane = jax.lax.broadcasted_iota(jnp.int32, (tb, VP_OUT), 1)
        tgt_logit = jnp.sum(jnp.where(vlane == tgt, logits, 0.0),
                            axis=-1, keepdims=True)          # (TB, 1)
        per_example = lse - tgt_logit                        # (TB, 1)
        if padded:                                           # mask batch padding
            row = (jax.lax.broadcasted_iota(jnp.int32, (tb, 1), 0)
                   + pl.program_id(0) * tb)
            per_example = jnp.where(row < b_total, per_example, 0.0)
        loss_ref[0] = jnp.sum(per_example, axis=0, keepdims=True)   # (1, 1)


def init_params(key):
    """Raw parameters matching the PyTorch module's init (weights transposed)."""
    k_emb, k_w1, k_w2 = jax.random.split(key, 3)
    embed = jax.random.normal(k_emb, (VOCAB, EMB), jnp.float32)       # N(0,1)
    fan_in, fan_out = CTX * EMB, HID
    bound1 = (5.0 / 3.0) * math.sqrt(6.0 / (fan_in + fan_out))        # xavier, gain 5/3
    w1 = jax.random.uniform(k_w1, (fan_in, HID), jnp.float32, -bound1, bound1)
    b1 = jnp.zeros((1, HID), jnp.float32)
    bound2 = 1.0 / math.sqrt(HID)
    w2 = jax.random.uniform(k_w2, (HID, VOCAB), jnp.float32, -bound2, bound2)
    b2 = jnp.zeros((1, VOCAB), jnp.float32)
    return embed, w1, b1, w2, b2


def prepare_params(params):
    """One-time prep: fold embedding into Linear1, pad everything lane-dense."""
    embed, w1, b1, w2, b2 = params
    w1_slots = w1.reshape(CTX, EMB, HID)                              # (C, E, H)
    fused = jnp.einsum('ve,ceh->cvh', embed, w1_slots)                # (C, V, H)
    fused = jnp.pad(fused, ((0, 0), (0, VP_IN - VOCAB), (0, HP - HID)))
    w1f = fused.reshape(K_IN, HP)                                     # (160, 128)
    b1p = jnp.pad(b1.reshape(1, HID), ((0, 0), (0, HP - HID)))
    w2p = jnp.pad(w2, ((0, HP - HID), (0, VP_OUT - VOCAB)))
    b2p = jnp.pad(b2.reshape(1, VOCAB), ((0, 0), (0, VP_OUT - VOCAB)),
                  constant_values=NEG)
    return w1f, b1p, w2p, b2p


def _round_up(x, m):
    return (x + m - 1) // m * m


def simplebook_forward(idx, targets, prepped, *, emit_logits=True):
    """Returns (padded_logits_or_None, loss_or_None).

    padded_logits has shape (PB, 128); real data lives in [:B, :VOCAB].  The
    slice is left to the consumer to avoid an extra full-tensor HBM copy.
    Set emit_logits=False on training steps that only need the loss.
    """
    w1f, b1p, w2p, b2p = prepped
    B = idx.shape[0]
    has_targets = targets is not None
    if not (emit_logits or has_targets):
        raise ValueError("nothing to compute: emit_logits=False and targets=None")

    # Batch tiling: large tiles amortize the ~0.35us/grid-step overhead; pick
    # TB ~= ceil(B/2) (capped at 2048, multiple of 8) so NB >= 2 once B >= 16
    # and the "parallel" axis spans both v7x TensorCores.
    TB_MAX = 2048
    TB = max(8, min(TB_MAX, _round_up(-(-B // 2), 8)))
    PB = _round_up(B, TB)
    NB = PB // TB
    padded = PB != B

    tgt = targets if has_targets else jnp.zeros((B,), jnp.int32)
    it = jnp.concatenate(
        [idx.astype(jnp.int32), tgt.reshape(B, 1).astype(jnp.int32)], axis=1)
    if padded:
        it = jnp.pad(it, ((0, PB - B), (0, 0)))

    kernel = functools.partial(
        simplebook_kernel, b_total=B, tb=TB, padded=padded,
        emit_logits=emit_logits, has_targets=has_targets)

    out_shape = []
    out_specs = []
    if emit_logits:
        out_shape.append(jax.ShapeDtypeStruct((PB, VP_OUT), jnp.float32))
        out_specs.append(pl.BlockSpec((TB, VP_OUT), lambda i: (i, 0)))
    if has_targets:
        out_shape.append(jax.ShapeDtypeStruct((NB, 1, 1), jnp.float32))
        out_specs.append(pl.BlockSpec((1, 1, 1), lambda i: (i, 0, 0)))

    flops = 2 * PB * (K_IN * HP + HP * VP_OUT)
    trans = PB * (HP + ((VP_OUT + 1) if has_targets else 0))
    bytes_accessed = 4 * (PB * (CTX + 1) + K_IN * HP + HP + HP * VP_OUT + VP_OUT
                          + (PB * VP_OUT if emit_logits else 0) + NB)

    outs = pl.pallas_call(
        kernel,
        out_shape=tuple(out_shape),
        grid=(NB,),
        in_specs=[
            pl.BlockSpec((TB, CTX + 1), lambda i: (i, 0)),   # token+target tile
            pl.BlockSpec((K_IN, HP), lambda i: (0, 0)),      # fused W1 (resident)
            pl.BlockSpec((1, HP), lambda i: (0, 0)),
            pl.BlockSpec((HP, VP_OUT), lambda i: (0, 0)),
            pl.BlockSpec((1, VP_OUT), lambda i: (0, 0)),
        ],
        out_specs=tuple(out_specs),
        compiler_params=pltpu.CompilerParams(
            dimension_semantics=("parallel",),
            vmem_limit_bytes=32 * 1024 * 1024),
        cost_estimate=pl.CostEstimate(
            flops=flops, transcendentals=trans, bytes_accessed=bytes_accessed),
    )(it, w1f, b1p, w2p, b2p)

    outs = list(outs) if isinstance(outs, (tuple, list)) else [outs]
    logits_pad = outs.pop(0) if emit_logits else None
    loss = (jnp.sum(outs.pop(0)) / B) if has_targets else None
    return logits_pad, loss


def simplebook_reference(idx, targets, params):
    embed, w1, b1, w2, b2 = params
    B = idx.shape[0]
    x = jnp.take(embed, idx, axis=0).reshape(B, CTX * EMB)
    h = jnp.tanh(x @ w1 + b1)
    logits = h @ w2 + b2
    logp = jax.nn.log_softmax(logits, axis=-1)
    loss = -jnp.mean(logp[jnp.arange(B), targets])
    return logits, loss


if __name__ == "__main__":
    key = jax.random.PRNGKey(0)
    k_params, k_idx, k_tgt = jax.random.split(key, 3)

    params = init_params(k_params)
    prepped = prepare_params(params)

    B = 8
    idx = jax.random.randint(k_idx, (B, CTX), 0, VOCAB, dtype=jnp.int32)
    targets = jax.random.randint(k_tgt, (B,), 0, VOCAB, dtype=jnp.int32)

    ref_logits, ref_loss = simplebook_reference(idx, targets, params)

    # 1) logits + loss
    logits_pad, loss = simplebook_forward(idx, targets, prepped)
    jax.block_until_ready((logits_pad, loss))
    logits = logits_pad[:B, :VOCAB]          # consumer-side slice (test only)
    assert logits.shape == (B, VOCAB)
    assert jnp.allclose(logits, ref_logits, atol=1e-4, rtol=1e-4)
    assert jnp.allclose(loss, ref_loss, atol=1e-4, rtol=1e-4)

    # 2) inference path: targets=None -> CE tail compiled out
    logits_pad2, loss2 = simplebook_forward(idx, None, prepped)
    jax.block_until_ready(logits_pad2)
    assert loss2 is None
    assert jnp.allclose(logits_pad2[:B, :VOCAB], ref_logits, atol=1e-4, rtol=1e-4)

    # 3) training path: loss only -> logits HBM writeback compiled out
    logits_pad3, loss3 = simplebook_forward(idx, targets, prepped,
                                            emit_logits=False)
    jax.block_until_ready(loss3)
    assert logits_pad3 is None
    assert jnp.allclose(loss3, ref_loss, atol=1e-4, rtol=1e-4)

    print("KERNEL_OK")
</pallas_src>

<mosaic_0001>
module attributes {stable_mosaic.version = 11 : i64} {
  func.func @simplebook_kernel(%arg0: i32, %arg1: memref<8x6xi32, #tpu.memory_space<vmem>>, %arg2: memref<160x128xf32, #tpu.memory_space<vmem>>, %arg3: memref<1x128xf32, #tpu.memory_space<vmem>>, %arg4: memref<128x128xf32, #tpu.memory_space<vmem>>, %arg5: memref<1x128xf32, #tpu.memory_space<vmem>>, %arg6: memref<8x128xf32, #tpu.memory_space<vmem>>, %arg7: memref<1x1x1xf32, #tpu.memory_space<vmem>>) attributes {dimension_semantics = [#tpu.dimension_semantics<parallel>], iteration_bounds = array<i64: 1>, scalar_prefetch = 0 : i64, scratch_operands = 0 : i64, tpu.core_type = #tpu.core_type<tc>, window_params = [{transform_indices = @transform_0, window_bounds = array<i64: 8, 6>}, {pipeline_mode = #tpu.pipeline_mode<synchronous>, transform_indices = @transform_1, window_bounds = array<i64: 160, 128>}, {pipeline_mode = #tpu.pipeline_mode<synchronous>, transform_indices = @transform_2, window_bounds = array<i64: 1, 128>}, {pipeline_mode = #tpu.pipeline_mode<synchronous>, transform_indices = @transform_3, window_bounds = array<i64: 128, 128>}, {pipeline_mode = #tpu.pipeline_mode<synchronous>, transform_indices = @transform_4, window_bounds = array<i64: 1, 128>}, {transform_indices = @transform_5, window_bounds = array<i64: 8, 128>}, {transform_indices = @transform_6, window_bounds = array<i64: 1, 1, 1>}]} {
    %c0 = arith.constant 0 : index
    %c0_0 = arith.constant 0 : index
    %0 = vector.load %arg1[%c0, %c0_0] : memref<8x6xi32, #tpu.memory_space<vmem>>, vector<8x6xi32>
    %1 = tpu.iota {dimensions = array<i32: 1>} : vector<8x160xi32>
    %2 = vector.extract_strided_slice %0 {offsets = [0, 0], sizes = [8, 1], strides = [1, 1]} : vector<8x6xi32> to vector<8x1xi32>
    %3 = vector.broadcast %2 : vector<8x1xi32> to vector<8x160xi32>
    %4 = arith.cmpi eq, %1, %3 : vector<8x160xi32>
    %5 = vector.extract_strided_slice %0 {offsets = [0, 1], sizes = [8, 1], strides = [1, 1]} : vector<8x6xi32> to vector<8x1xi32>
    %c32_i32 = arith.constant 32 : i32
    %6 = vector.broadcast %c32_i32 : i32 to vector<8x1xi32>
    %7 = arith.addi %5, %6 : vector<8x1xi32>
    %8 = vector.broadcast %7 : vector<8x1xi32> to vector<8x160xi32>
    %9 = arith.cmpi eq, %1, %8 : vector<8x160xi32>
    %10 = arith.ori %4, %9 : vector<8x160xi1>
    %11 = vector.extract_strided_slice %0 {offsets = [0, 2], sizes = [8, 1], strides = [1, 1]} : vector<8x6xi32> to vector<8x1xi32>
    %c64_i32 = arith.constant 64 : i32
    %12 = vector.broadcast %c64_i32 : i32 to vector<8x1xi32>
    %13 = arith.addi %11, %12 : vector<8x1xi32>
    %14 = vector.broadcast %13 : vector<8x1xi32> to vector<8x160xi32>
    %15 = arith.cmpi eq, %1, %14 : vector<8x160xi32>
    %16 = arith.ori %10, %15 : vector<8x160xi1>
    %17 = vector.extract_strided_slice %0 {offsets = [0, 3], sizes = [8, 1], strides = [1, 1]} : vector<8x6xi32> to vector<8x1xi32>
    %c96_i32 = arith.constant 96 : i32
    %18 = vector.broadcast %c96_i32 : i32 to vector<8x1xi32>
    %19 = arith.addi %17, %18 : vector<8x1xi32>
    %20 = vector.broadcast %19 : vector<8x1xi32> to vector<8x160xi32>
    %21 = arith.cmpi eq, %1, %20 : vector<8x160xi32>
    %22 = arith.ori %16, %21 : vector<8x160xi1>
    %23 = vector.extract_strided_slice %0 {offsets = [0, 4], sizes = [8, 1], strides = [1, 1]} : vector<8x6xi32> to vector<8x1xi32>
    %c128_i32 = arith.constant 128 : i32
    %24 = vector.broadcast %c128_i32 : i32 to vector<8x1xi32>
    %25 = arith.addi %23, %24 : vector<8x1xi32>
    %26 = vector.broadcast %25 : vector<8x1xi32> to vector<8x160xi32>
    %27 = arith.cmpi eq, %1, %26 : vector<8x160xi32>
    %28 = arith.ori %22, %27 : vector<8x160xi1>
    %29 = arith.extui %28 : vector<8x160xi1> to vector<8x160xi32>
    %30 = arith.sitofp %29 : vector<8x160xi32> to vector<8x160xf32>
    %c0_1 = arith.constant 0 : index
    %c0_2 = arith.constant 0 : index
    %31 = vector.load %arg2[%c0_1, %c0_2] : memref<160x128xf32, #tpu.memory_space<vmem>>, vector<160x128xf32>
    %cst = arith.constant dense<0.000000e+00> : vector<8x128xf32>
    %32 = tpu.matmul %30, %31, %cst {dimension_numbers = #tpu.dot_dimension_numbers<[1], [0], [0], [1], [0, 0, 1, 1], [], []>} : vector<8x160xf32>, vector<160x128xf32>, vector<8x128xf32> -> vector<8x128xf32>
    %c0_3 = arith.constant 0 : index
    %c0_4 = arith.constant 0 : index
    %33 = vector.load %arg3[%c0_3, %c0_4] : memref<1x128xf32, #tpu.memory_space<vmem>>, vector<1x128xf32>
    %34 = vector.broadcast %33 : vector<1x128xf32> to vector<8x128xf32>
    %35 = arith.addf %32, %34 : vector<8x128xf32>
    %36 = math.tanh %35 : vector<8x128xf32>
    %c0_5 = arith.constant 0 : index
    %c0_6 = arith.constant 0 : index
    %37 = vector.load %arg4[%c0_5, %c0_6] : memref<128x128xf32, #tpu.memory_space<vmem>>, vector<128x128xf32>
    %cst_7 = arith.constant dense<0.000000e+00> : vector<8x128xf32>
    %38 = tpu.matmul %36, %37, %cst_7 {dimension_numbers = #tpu.dot_dimension_numbers<[1], [0], [0], [1], [0, 0, 1, 1], [], []>} : vector<8x128xf32>, vector<128x128xf32>, vector<8x128xf32> -> vector<8x128xf32>
    %c0_8 = arith.constant 0 : index
    %c0_9 = arith.constant 0 : index
    %39 = vector.load %arg5[%c0_8, %c0_9] : memref<1x128xf32, #tpu.memory_space<vmem>>, vector<1x128xf32>
    %40 = vector.broadcast %39 : vector<1x128xf32> to vector<8x128xf32>
    %41 = arith.addf %38, %40 : vector<8x128xf32>
    %c0_10 = arith.constant 0 : index
    %c0_11 = arith.constant 0 : index
    %42 = vector.load %arg6[%c0_10, %c0_11] : memref<8x128xf32, #tpu.memory_space<vmem>>, vector<8x128xf32>
    tpu.vector_store %arg6[%c0_10, %c0_11], %41 {strides = array<i32>} : memref<8x128xf32, #tpu.memory_space<vmem>>, vector<8x128xf32>,
    %cst_12 = arith.constant dense<0xFF800000> : vector<8xf32>
    %43 = vector.multi_reduction <maximumf>, %41, %cst_12 [1] : vector<8x128xf32> to vector<8xf32>
    %44 = vector.shape_cast %43 : vector<8xf32> to vector<8x1xf32>
    %45 = vector.broadcast %44 : vector<8x1xf32> to vector<8x128xf32>
    %46 = arith.subf %41, %45 : vector<8x128xf32>
    %47 = math.exp %46 : vector<8x128xf32>
    %cst_13 = arith.constant dense<0.000000e+00> : vector<8xf32>
    %48 = vector.multi_reduction <add>, %47, %cst_13 [1] : vector<8x128xf32> to vector<8xf32>
    %49 = vector.shape_cast %48 : vector<8xf32> to vector<8x1xf32>
    %50 = math.log %49 : vector<8x1xf32>
    %51 = arith.addf %44, %50 : vector<8x1xf32>
    %52 = vector.extract_strided_slice %0 {offsets = [0, 5], sizes = [8, 1], strides = [1, 1]} : vector<8x6xi32> to vector<8x1xi32>
    %53 = tpu.iota {dimensions = array<i32: 1>} : vector<8x128xi32>
    %54 = vector.broadcast %52 : vector<8x1xi32> to vector<8x128xi32>
    %55 = arith.cmpi eq, %53, %54 : vector<8x128xi32>
    %cst_14 = arith.constant 0.000000e+00 : f32
    %56 = vector.broadcast %cst_14 : f32 to vector<8x128xf32>
    %57 = arith.select %55, %41, %56 : vector<8x128xi1>, vector<8x128xf32>
    %cst_15 = arith.constant dense<0.000000e+00> : vector<8xf32>
    %58 = vector.multi_reduction <add>, %57, %cst_15 [1] : vector<8x128xf32> to vector<8xf32>
    %59 = vector.shape_cast %58 : vector<8xf32> to vector<8x1xf32>
    %60 = arith.subf %51, %59 : vector<8x1xf32>
    %cst_16 = arith.constant dense<0.000000e+00> : vector<1xf32>
    %61 = vector.multi_reduction <add>, %60, %cst_16 [0] : vector<8x1xf32> to vector<1xf32>
    %62 = vector.shape_cast %61 : vector<1xf32> to vector<1x1xf32>
    %c0_17 = arith.constant 0 : index
    %c0_18 = arith.constant 0 : index
    %c0_19 = arith.constant 0 : index
    %63 = vector.load %arg7[%c0_17, %c0_18, %c0_19] : memref<1x1x1xf32, #tpu.memory_space<vmem>>, vector<1x1x1xf32>
    %64 = vector.shape_cast %63 : vector<1x1x1xf32> to vector<1x1xf32>
    %65 = vector.shape_cast %62 : vector<1x1xf32> to vector<1x1x1xf32>
    tpu.vector_store %arg7[%c0_17, %c0_18, %c0_19], %65 {strides = array<i32>} : memref<1x1x1xf32, #tpu.memory_space<vmem>>, vector<1x1x1xf32>,
    return
  }
  func.func @transform_0(%arg0: i32) -> (i32, i32) {
    %c0_i32 = arith.constant 0 : i32
    %c0_i32_0 = arith.constant 0 : i32
    return %arg0, %c0_i32 : i32, i32
  }
  func.func @transform_1(%arg0: i32) -> (i32, i32) {
    %c0_i32 = arith.constant 0 : i32
    %c0_i32_0 = arith.constant 0 : i32
    %c0_i32_1 = arith.constant 0 : i32
    return %c0_i32, %c0_i32_0 : i32, i32
  }
  func.func @transform_2(%arg0: i32) -> (i32, i32) {
    %c0_i32 = arith.constant 0 : i32
    %c0_i32_0 = arith.constant 0 : i32
    %c0_i32_1 = arith.constant 0 : i32
    return %c0_i32, %c0_i32_0 : i32, i32
  }
  func.func @transform_3(%arg0: i32) -> (i32, i32) {
    %c0_i32 = arith.constant 0 : i32
    %c0_i32_0 = arith.constant 0 : i32
    %c0_i32_1 = arith.constant 0 : i32
    return %c0_i32, %c0_i32_0 : i32, i32
  }
  func.func @transform_4(%arg0: i32) -> (i32, i32) {
    %c0_i32 = arith.constant 0 : i32
    %c0_i32_0 = arith.constant 0 : i32
    %c0_i32_1 = arith.constant 0 : i32
    return %c0_i32, %c0_i32_0 : i32, i32
  }
  func.func @transform_5(%arg0: i32) -> (i32, i32) {
    %c0_i32 = arith.constant 0 : i32
    %c0_i32_0 = arith.constant 0 : i32
    return %arg0, %c0_i32 : i32, i32
  }
  func.func @transform_6(%arg0: i32) -> (i32, i32, i32) {
    %c0_i32 = arith.constant 0 : i32
    %c0_i32_0 = arith.constant 0 : i32
    %c0_i32_1 = arith.constant 0 : i32
    return %arg0, %c0_i32, %c0_i32_0 : i32, i32, i32
  }
}

</mosaic_0001>

<bundles_post_ra>
// kernel: tpu_custom_call.1
= control target key start
LH: loop header
LB: loop body
LE: loop exit
PB: predicated region body
PF: predicated region fallthrough
CT: control target
= control target key end

     0   :  { %12 = vsyncpa [#allocation3], 0  ;;  %s776_s0 = inlined_call_operand.hbm [shape: s32[8,6], index: 0, kind: input, shape index: {}]   ;;  %s777_s1 = inlined_call_operand.hbm [shape: f32[160,128], index: 1, kind: input, shape index: {}]   ;;  %s778_s2 = inlined_call_operand.vmem [shape: f32[1,128], index: 2, kind: input, shape index: {}]   ;;  %s779_s3 = inlined_call_operand.hbm [shape: f32[128,128], index: 3, kind: input, shape index: {}]   ;;  %s780_s4 = inlined_call_operand.vmem [shape: f32[1,128], index: 4, kind: input, shape index: {}]   ;;  %s781_s5 = inlined_call_operand.hbm [shape: f32[8,128], index: 5, kind: output, shape index: {0}]   ;;  %s782_s6 = inlined_call_operand.hbm [shape: f32[1,1,1], index: 6, kind: output, shape index: {1}]  }
   0x1   :  { %13 = vsyncpa [#allocation6], 0 }
   0x2   :  { %14 = vsyncpa [#allocation4], 0 }
   0x3   :  { %15 = vsyncpa [#allocation10], 0  ;;  %s618_s21 = smov [#allocation5]   ;;  %s500_s25 = scalar_lea.hbm %s777_s1, 2560 }
   0x4   :  { %s31_s22 = sshll.u32 %s618_s21, 4  ;;  %p501_p0 = scmp.ne.s32.totalorder %s777_s1, %s500_s25  ;;  %s32_s22 = int_to_ptr.vmem [resolvable:$true] %s31_s22 }
   0x5   :  { %p504_p1 = scmp.lt.u32.totalorder %s500_s25, %s777_s1 }
   0x7   :  { %p506_p2 = pnand %p504_p1, %p501_p0 }
   0x9   :  { %509 = shalt.err (!%p506_p2)
}
   0xa   :  { %s510_s30 = scalar_lea.vmem %s32_s22, 2560  ;;  %p515_p4 = scmp.lt.s32.totalorder %s32_s22, %s32_s22 }
   0xb   :  { %p511_p3 = scmp.ne.s32.totalorder %s32_s22, %s510_s30  ;;  %p516_p5 = scmp.lt.s32.totalorder %s510_s30, %s510_s30 }
   0xd   :  { %p517_p6 = por %p516_p5, %p515_p4 }
   0xf   :  { %p518_p7 = pnand %p517_p6, %p511_p3 }
  0x11   :  { %521 = shalt.err (!%p518_p7)
}
  0x12   :  { %s619_s7 = smov 128   ;;  %s620_s8 = smov 8  }
  0x13   :  { %37 = dma.hbm_to_vmem [thread:$0]  %s777_s1, 2560, %s32_s22, [#allocation6], %s619_s7, %s619_s7, %s620_s8  }
  0x14   :  { %s621_s11 = smov [#allocation2]   ;;  %s622_s13 = smov [#allocation7]  }
  0x15   :  { %s22_s12 = sshll.u32 %s621_s11, 4  ;;  %s45_s14 = sshll.u32 %s622_s13, 4  ;;  %s23_s12 = int_to_ptr.vmem [resolvable:$true] %s22_s12  ;;  %s46_s14 = int_to_ptr.vmem [resolvable:$true] %s45_s14 }
  0x16   :  { %s522_s17 = scalar_lea.hbm %s776_s0, 128 }
  0x17   :  { %p523_p8 = scmp.ne.s32.totalorder %s776_s0, %s522_s17  ;;  %p526_p9 = scmp.lt.u32.totalorder %s522_s17, %s776_s0 }
  0x19   :  { %p528_p10 = pnand %p526_p9, %p523_p8 }
  0x1b   :  { %531 = shalt.err (!%p528_p10)
}
  0x1c   :  { %s532_s1 = scalar_lea.vmem %s23_s12, 128  ;;  %p537_p12 = scmp.lt.s32.totalorder %s23_s12, %s23_s12 }
  0x1d   :  { %p533_p11 = scmp.ne.s32.totalorder %s23_s12, %s532_s1  ;;  %p538_p13 = scmp.lt.s32.totalorder %s532_s1, %s532_s1 }
  0x1f   :  { %p539_p0 = por %p538_p13, %p537_p12 }
  0x21   :  { %p540_p1 = pnand %p539_p0, %p533_p11 }
  0x23   :  { %543 = shalt.err (!%p540_p1)
}
  0x24   :  { %25 = dma.hbm_to_vmem [thread:$0]  %s776_s0, 128, %s23_s12, [#allocation3]  }
  0x25   :  { %s544_s26 = scalar_lea.hbm %s779_s3, 2048 }
  0x26   :  { %p545_p2 = scmp.ne.s32.totalorder %s779_s3, %s544_s26  ;;  %p548_p3 = scmp.lt.u32.totalorder %s544_s26, %s779_s3 }
  0x28   :  { %p550_p4 = pnand %p548_p3, %p545_p2 }
  0x2a   :  { %553 = shalt.err (!%p550_p4)
}
  0x2b   :  { %s554_s9 = scalar_lea.vmem %s46_s14, 2048  ;;  %p559_p6 = scmp.lt.s32.totalorder %s46_s14, %s46_s14 }
  0x2c   :  { %p555_p5 = scmp.ne.s32.totalorder %s46_s14, %s554_s9  ;;  %p560_p7 = scmp.lt.s32.totalorder %s554_s9, %s554_s9 }
  0x2e   :  { %p561_p8 = por %p560_p7, %p559_p6 }
  0x30   :  { %p562_p9 = pnand %p561_p8, %p555_p5 }
  0x32   :  { %565 = shalt.err (!%p562_p9)
}
  0x33   :  { %51 = dma.hbm_to_vmem [thread:$0]  %s779_s3, 2048, %s46_s14, [#allocation6], %s619_s7, %s619_s7, %s620_s8  }
  0x34   :  { %610 = dma.done.wait [#allocation3], 128  }
  0x35   :  { %611 = vsyncadd [#allocation3], 4294967168 }
  0x36   :  { %612 = dma.done.wait [#allocation6], 4608  }
  0x37   :  { %613 = vsyncadd [#allocation6], 4294962688  ;;  %v623_v0 = vmov 0   ;;  %v624_v1 = vmov 2   ;;  %v625_v2 = vmov 0.0|0.0   ;;  %v713_v3 = vld [vmem:[#allocation2] sm:$0xff]  ;;  %v64_v56 = vlaneseq }
  0x38   :  { %487 = vset.pattern.permute.xlu0 %v623_v0  ;;  %489 = vset.pattern.permute.xlu1 %v624_v1  ;;  %v108_v4 = vld [vmem:[#allocation5] sm:$0xff]  ;;  %v109_v5 = vld [vmem:[#allocation5 + $0x8] sm:$0xff]  ;;  %v80_v6 = vadd.s32 64, %v713_v3  ;;  %v110_v7 = vld [vmem:[#allocation5 + $0x10] sm:$0xff]  ;;  %v72_v9 = vadd.s32 32, %v713_v3  ;;  %v88_v11 = vadd.s32 96, %v713_v3 }
  0x39   :  { %417 = vmatprep.subr.bf16.mxu0 %v625_v2  ;;  %447 = vmatprep.subr.bf16.mxu1 %v625_v2  ;;  %v111_v8 = vld [vmem:[#allocation5 + $0x18] sm:$0xff]  ;;  %v418_v10 = vpack.c.bf16 %v109_v5, %v108_v4  ;;  %v626_v13 = vmov 1   ;;  %v112_v14 = vld [vmem:[#allocation5 + $0x20] sm:$0xff]  ;;  %v113_v15 = vld [vmem:[#allocation5 + $0x28] sm:$0xff]  ;;  %v627_v16 = vmov 3   ;;  %v96_v18 = vadd.s32 128, %v713_v3 }
  0x3a   :  { %68 = vperm.xlu0 %487, %v713_v3   ;;  %82 = vperm.xlu1 %489, %v80_v6   ;;  %v421_v12 = vpack.c.bf16 %v111_v8, %v110_v7  ;;  %v424_v17 = vpack.c.bf16 %v113_v15, %v112_v14  ;;  %v114_v19 = vld [vmem:[#allocation5 + $0x30] sm:$0xff]  ;;  %v115_v20 = vld [vmem:[#allocation5 + $0x38] sm:$0xff]  ;;  %v628_v21 = vmov 4   ;;  %v116_v23 = vld [vmem:[#allocation5 + $0x40] sm:$0xff]  ;;  %v734_v57 = vand.u32 127, %v64_v56 }
  0x3b   :  { %419 = vmatpush1.bf16.msra.mxu0 %v418_v10  ;;  %v427_v22 = vpack.c.bf16 %v115_v20, %v114_v19  ;;  %v117_v24 = vld [vmem:[#allocation5 + $0x48] sm:$0xff]  ;;  %v118_v26 = vld [vmem:[#allocation5 + $0x50] sm:$0xff]  ;;  %v119_v27 = vld [vmem:[#allocation5 + $0x58] sm:$0xff]  ;;  %v629_v0 = vmov 0.0   ;;  %v631_v14 = vmov 5  }
  0x3c   :  { %420 = vmatprep.subr.bf16.mxu0 %v625_v2  ;;  %v430_v25 = vpack.c.bf16 %v117_v24, %v116_v23  ;;  %v210_v28 = vld [vmem:[#allocation7] sm:$0xff]  ;;  %v211_v29 = vld [vmem:[#allocation7 + $0x8] sm:$0xff]  ;;  %v212_v30 = vld [vmem:[#allocation7 + $0x10] sm:$0xff]  ;;  %v433_v33 = vpack.c.bf16 %v119_v27, %v118_v26  ;;  %v66_v60 = vadd.s32 128, %v734_v57 }
  0x3d   :  { %v448_v31 = vpack.c.bf16 %v211_v29, %v210_v28  ;;  %v213_v32 = vld [vmem:[#allocation7 + $0x18] sm:$0xff]  ;;  %v120_v34 = vld [vmem:[#allocation5 + $0x60] sm:$0xff]  ;;  %v121_v36 = vld [vmem:[#allocation5 + $0x68] sm:$0xff] }
  0x3e   :  { %488 = vset.pattern.permute.xlu0 %v626_v13  ;;  %490 = vset.pattern.permute.xlu1 %v627_v16  ;;  %v451_v35 = vpack.c.bf16 %v213_v32, %v212_v30  ;;  %v214_v37 = vld [vmem:[#allocation7 + $0x20] sm:$0xff]  ;;  %v215_v38 = vld [vmem:[#allocation7 + $0x28] sm:$0xff]  ;;  %v436_v39 = vpack.c.bf16 %v121_v36, %v120_v34  ;;  %v122_v40 = vld [vmem:[#allocation5 + $0x70] sm:$0xff] }
  0x3f   :  { %74 = vperm.xlu0 %488, %v72_v9   ;;  %90 = vperm.xlu1 %490, %v88_v11   ;;  %v454_v41 = vpack.c.bf16 %v215_v38, %v214_v37  ;;  %v123_v42 = vld [vmem:[#allocation5 + $0x78] sm:$0xff]  ;;  %v216_v43 = vld [vmem:[#allocation7 + $0x30] sm:$0xff]  ;;  %v124_v46 = vld [vmem:[#allocation5 + $0x80] sm:$0xff] }
  0x40   :  { %422 = vmatpush1.bf16.msra.mxu0 %v421_v12  ;;  %449 = vmatpush3.bf16.msra.mxu1 %v448_v31  ;;  %v217_v44 = vld [vmem:[#allocation7 + $0x38] sm:$0xff]  ;;  %v439_v45 = vpack.c.bf16 %v123_v42, %v122_v40  ;;  %v125_v48 = vld [vmem:[#allocation5 + $0x88] sm:$0xff]  ;;  %v218_v49 = vld [vmem:[#allocation7 + $0x40] sm:$0xff] }
  0x41   :  { %423 = vmatprep.subr.bf16.mxu0 %v625_v2  ;;  %450 = vmatprep.subr.bf16.mxu1 %v625_v2  ;;  %v457_v47 = vpack.c.bf16 %v217_v44, %v216_v43  ;;  %v219_v50 = vld [vmem:[#allocation7 + $0x48] sm:$0xff]  ;;  %v442_v51 = vpack.c.bf16 %v125_v48, %v124_v46  ;;  %v126_v53 = vld [vmem:[#allocation5 + $0x90] sm:$0xff]  ;;  %v127_v54 = vld [vmem:[#allocation5 + $0x98] sm:$0xff] }
  0x42   :  { %v460_v52 = vpack.c.bf16 %v219_v50, %v218_v49  ;;  %v445_v55 = vpack.c.bf16 %v127_v54, %v126_v53  ;;  %v220_v5 = vld [vmem:[#allocation7 + $0x50] sm:$0xff]  ;;  %v221_v6 = vld [vmem:[#allocation7 + $0x58] sm:$0xff]  ;;  %v222_v7 = vld [vmem:[#allocation7 + $0x60] sm:$0xff] }
  0x43   :  { %491 = vset.pattern.permute.xlu1 %v628_v21  ;;  %v463_v8 = vpack.c.bf16 %v221_v6, %v220_v5  ;;  %v223_v9 = vld [vmem:[#allocation7 + $0x68] sm:$0xff]  ;;  %v224_v11 = vld [vmem:[#allocation7 + $0x70] sm:$0xff]  ;;  %v225_v12 = vld [vmem:[#allocation7 + $0x78] sm:$0xff]  ;;  %493 = vset.pattern.permute.xlu0 %v631_v14 }
  0x44   :  { %425 = vmatpush1.bf16.msra.mxu0 %v424_v17  ;;  %98 = vperm.xlu1 %491, %v96_v18   ;;  %v466_v10 = vpack.c.bf16 %v223_v9, %v222_v7  ;;  %v469_v13 = vpack.c.bf16 %v225_v12, %v224_v11  ;;  %v362_v15 = vld [vmem:[%s778_s2] ss:$0 sm:$0xff]  ;;  %s632_s2 = smov [#allocation8]  }
  0x45   :  { %426 = vmatprep.subr.bf16.mxu0 %v625_v2  ;;  %452 = vmatpush3.bf16.msra.mxu1 %v451_v35  ;;  %s336_s12 = sshll.u32 %s632_s2, 4  ;;  %s337_s12 = int_to_ptr.vmem [resolvable:$true] %s336_s12 }
  0x46   :  { %453 = vmatprep.subr.bf16.mxu1 %v625_v2  ;;  %p571_p11 = scmp.lt.s32.totalorder %s337_s12, %s337_s12 }
  0x48   :  { %428 = vmatpush1.bf16.msra.mxu0 %v427_v22  ;;  %492 = vset.pattern.permute.xlu1 %v631_v14 }
  0x49   :  { %429 = vmatprep.subr.bf16.mxu0 %v625_v2  ;;  %455 = vmatpush3.bf16.msra.mxu1 %v454_v41 }
  0x4a   :  { %456 = vmatprep.subr.bf16.mxu1 %v625_v2  ;;  %315 = vperm.xlu1 %492, %v713_v3  }
  0x4c   :  { %431 = vmatpush1.bf16.msra.mxu0 %v430_v25 }
  0x4d   :  { %432 = vmatprep.subr.bf16.mxu0 %v625_v2  ;;  %458 = vmatpush3.bf16.msra.mxu1 %v457_v47 }
  0x4e   :  { %459 = vmatprep.subr.bf16.mxu1 %v625_v2 }
  0x50   :  { %434 = vmatpush1.bf16.msra.mxu0 %v433_v33 }
  0x51   :  { %435 = vmatprep.subr.bf16.mxu0 %v625_v2  ;;  %461 = vmatpush3.bf16.msra.mxu1 %v460_v52 }
  0x52   :  { %462 = vmatprep.subr.bf16.mxu1 %v625_v2 }
  0x54   :  { %437 = vmatpush1.bf16.msra.mxu0 %v436_v39 }
  0x55   :  { %438 = vmatprep.subr.bf16.mxu0 %v625_v2  ;;  %464 = vmatpush3.bf16.msra.mxu1 %v463_v8 }
  0x56   :  { %465 = vmatprep.subr.bf16.mxu1 %v625_v2 }
  0x58   :  { %440 = vmatpush1.bf16.msra.mxu0 %v439_v45 }
  0x59   :  { %441 = vmatprep.subr.bf16.mxu0 %v625_v2  ;;  %467 = vmatpush3.bf16.msra.mxu1 %v466_v10 }
  0x5a   :  { %468 = vmatprep.subr.bf16.mxu1 %v625_v2 }
  0x5c   :  { %443 = vmatpush1.bf16.msra.mxu0 %v442_v51 }
  0x5d   :  { %444 = vmatprep.subr.bf16.mxu0 %v625_v2  ;;  %470 = vmatpush3.bf16.msra.mxu1 %v469_v13  ;;  %v364_v2 = vld [vmem:[%s780_s4] ss:$0 sm:$0xff]  ;;  %s566_s4 = scalar_lea.vmem %s337_s12, 128 }
  0x5e   :  { %p567_p10 = scmp.ne.s32.totalorder %s337_s12, %s566_s4  ;;  %p572_p12 = scmp.lt.s32.totalorder %s566_s4, %s566_s4 }
  0x60   :  { %446 = vmatpush1.bf16.msra.mxu0 %v445_v55  ;;  %p573_p13 = por %p572_p12, %p571_p11 }
  0x62   :  { %p574_p0 = pnand %p573_p13, %p567_p10 }
  0xb9   :  { %v69_v58 = vpop.permute.xlu0 %68  ;;  %v83_v59 = vpop.permute.xlu1 %82 }
  0xba   :  { %vm70_vm0 = vcmp.eq.s32.totalorder %v734_v57, %v69_v58  ;;  %vm71_vm1 = vcmp.eq.s32.totalorder %v66_v60, %v69_v58  ;;  %vm84_vm5 = vcmp.eq.s32.totalorder %v734_v57, %v83_v59  ;;  %vm85_vm9 = vcmp.eq.s32.totalorder %v66_v60, %v83_v59 }
  0xbe   :  { %v75_v61 = vpop.permute.xlu0 %74  ;;  %v91_v62 = vpop.permute.xlu1 %90 }
  0xbf   :  { %vm76_vm2 = vcmp.eq.s32.totalorder %v734_v57, %v75_v61  ;;  %vm77_vm3 = vcmp.eq.s32.totalorder %v66_v60, %v75_v61  ;;  %vm92_vm8 = vcmp.eq.s32.totalorder %v734_v57, %v91_v62  ;;  %vm93_vm10 = vcmp.eq.s32.totalorder %v66_v60, %v91_v62 }
  0xc0   :  { %vm78_vm4 = vmor %vm70_vm0, %vm76_vm2  ;;  %vm135_vm0 = vcmask 261120  }
  0xc1   :  { %vm79_vm6 = vmor %vm71_vm1, %vm77_vm3  ;;  %vm630_vm3 = vmmov 0  }
  0xc2   :  { %vm86_vm7 = vmor %vm78_vm4, %vm84_vm5  ;;  %414 = vmatprep.mubr.msk.f32.mxu1 %vm630_vm3, %v629_v0 }
  0xc3   :  { %vm87_vm11 = vmor %vm79_vm6, %vm85_vm9  ;;  %v99_v63 = vpop.permute.xlu1 %98 }
  0xc4   :  { %vm94_vm12 = vmor %vm86_vm7, %vm92_vm8  ;;  %vm100_vm13 = vcmp.eq.s32.totalorder %v734_v57, %v99_v63  ;;  %vm101_vm14 = vcmp.eq.s32.totalorder %v66_v60, %v99_v63 }
  0xc5   :  { %vm95_vm15 = vmor %vm87_vm11, %vm93_vm10 }
  0xc6   :  { %vm103_vm2 = vmor %vm95_vm15, %vm101_vm14 }
  0xc7   :  { %v361_v1 = vsel %vm103_vm2, 1.0, %v629_v0  ;;  %vm102_vm1 = vmor %vm94_vm12, %vm100_vm13 }
  0xc8   :  { %363 = vmatprep.mubr.msk.f32.mxu0 %vm135_vm0, %v361_v1  ;;  %v360_v4 = vsel %vm102_vm1, 1.0, %v629_v0 }
  0xc9   :  { %204 = vmatmul.mubr.f32.vlgmr.msra.gmra.mrb[0].mxu0 %v360_v4  ;;  %v316_v21 = vpop.permute.xlu1 %315 }
  0xca   :  { %vm317_vm4 = vcmp.eq.s32.totalorder %v734_v57, %v316_v21 }
 0x19c   :  { %v205_v16 = vpop.f32.mrb[0].mxu0 }
 0x19d   :  { %v206_v17 = vadd.f32 %v362_v15, %v205_v16  ;;  %v207_v18 = vpop.f32.mrb[1].mxu0 }
 0x19f   :  { %494 = vtanh.f32 %v206_v17 }
 0x1a9   :  { %v495_v19 = vpop.eup %494 }
 0x1aa   :  { %415 = vmatmul.mubr.f32.vlgmr.msra.gmra.mrb[0].mxu1 %v495_v19 }
 0x27d   :  { %v299_v20 = vpop.f32.mrb[0].mxu1 }
 0x27e   :  { %v300_v22 = vadd.f32 %v364_v2, %v299_v20  ;;  %v416_v23 = vpop.f32.mrb[1].mxu1 }
 0x280   :  { %303 = vst [vmem:[#allocation8] sm:$0xff] %v300_v22  ;;  %304 = vmax.xlane.f32.xlu0 %v300_v22  ;;  %v318_v3 = vsel %vm317_vm4, %v300_v22, 0.0 }
 0x284   :  { %319 = vadd.xlane.f32.xlu0 %v318_v3 }
 0x30d   :  { %v305_v24 = vpop.xlane.xlu0 %304 }
 0x30e   :  { %v306_v25 = vsub.f32 %v300_v22, %v305_v24 }
 0x310   :  { %v307_v26 = vmul.f32 1.442695, %v306_v25 }
 0x312   :  { %496 = vpow2.f32 %v307_v26 }
 0x31c   :  { %v497_v27 = vpop.eup %496 }
 0x31d   :  { %309 = vadd.xlane.f32.xlu1 %v497_v27 }
 0x31e   :  { %577 = shalt.err (!%p574_p0)
}
 0x31f   :  { %s578_s15 = scalar_lea.hbm %s781_s5, 128 }
 0x320   :  { %p579_p1 = scmp.ne.s32.totalorder %s781_s5, %s578_s15  ;;  %p582_p2 = scmp.lt.u32.totalorder %s578_s15, %s781_s5 }
 0x322   :  { %p584_p3 = pnand %p582_p2, %p579_p1 }
 0x324   :  { %587 = shalt.err (!%p584_p3)
}
 0x325   :  { %339 = dma.vmem_to_hbm [thread:$0]  %s337_s12, 128, %s781_s5, [#allocation4]   ;;  %v320_v32 = vpop.xlane.xlu0 %319  ;;  %vm328_vm5 = vcmask 0  }
 0x326   :  { %s633_s1 = smov [#allocation9]  }
 0x327   :  { %s346_s22 = sshll.u32 %s633_s1, 4  ;;  %s347_s22 = int_to_ptr.vmem [resolvable:$true] %s346_s22 }
 0x328   :  { %s588_s23 = scalar_lea.vmem %s347_s22, 16  ;;  %s592_s5 = scalar_lea.vmem %s347_s22, 32 }
 0x329   :  { %p589_p4 = scmp.ne.s32.totalorder %s347_s22, %s588_s23  ;;  %p593_p5 = scmp.lt.s32.totalorder %s347_s22, %s347_s22 }
 0x32a   :  { %p594_p6 = scmp.lt.s32.totalorder %s592_s5, %s588_s23 }
 0x32c   :  { %p595_p7 = por %p594_p6, %p593_p5 }
 0x32e   :  { %p596_p8 = pnand %p595_p7, %p589_p4 }
 0x3aa   :  { %v310_v28 = vpop.xlane.xlu1 %309 }
 0x3ab   :  { %498 = vlog2.f32 %v310_v28 }
 0x3b5   :  { %v499_v29 = vpop.eup %498 }
 0x3b6   :  { %v312_v30 = vmul.f32 0.6931472, %v499_v29 }
 0x3b8   :  { %v313_v31 = vadd.f32 %v312_v30, %v305_v24 }
 0x3ba   :  { %v321_v33 = vsub.f32 %v313_v31, %v320_v32 }
 0x3bc   :  { %v322_v34 = vrot.slane %v321_v33, 4 }
 0x3be   :  { %v323_v35 = vadd.f32 %v322_v34, %v321_v33 }
 0x3c0   :  { %v324_v36 = vrot.slane %v323_v35, 2 }
 0x3c2   :  { %v325_v37 = vadd.f32 %v324_v36, %v323_v35 }
 0x3c4   :  { %v326_v38 = vrot.slane %v325_v37, 1 }
 0x3c6   :  { %v327_v39 = vadd.f32 %v326_v38, %v325_v37 }
 0x3c8   :  { %329 = vst.msk [vmem:[#allocation9] sm:$0x1] %vm328_vm5, %v327_v39 }
 0x3c9   :  { %599 = shalt.err (!%p596_p8)
}
 0x3ca   :  { %s600_s26 = scalar_lea.hbm %s782_s6, 16 }
 0x3cb   :  { %p601_p9 = scmp.ne.s32.totalorder %s782_s6, %s600_s26  ;;  %p604_p10 = scmp.lt.u32.totalorder %s600_s26, %s782_s6 }
 0x3cd   :  { %p606_p11 = pnand %p604_p10, %p601_p9 }
 0x3cf   :  { %609 = shalt.err (!%p606_p11)
}
 0x3d0   :  { %349 = dma.vmem_to_hbm [thread:$0]  %s347_s22, 16, %s782_s6, [#allocation10]  }
 0x3d1   :  { %614 = dma.done.wait [#allocation4], 128  }
 0x3d2   :  { %615 = vsyncadd [#allocation4], 4294967168 }
 0x3d3   :  { %616 = dma.done.wait [#allocation10], 16  }
 0x3d4   :  { %617 = vsyncadd [#allocation10], 4294967280 }
 0x3d5   :  { %356 = vsyncpa [#allocation3], 1 }
 0x3d6   :  { %357 = vsyncpa [#allocation6], 1 }
 0x3d7   :  { %358 = vsyncpa [#allocation4], 1 }
 0x3d8   :  { %359 = vsyncpa [#allocation10], 1 }

</bundles_post_ra>
